<compile_context>
chip_gen: v6e
topology: v6e:2x2x1
jax: 0.10.0
libtpu: 0.0.40
codegen_flags: <defaults>
</compile_context>

<pallas_src>
import math
import jax
import jax.numpy as jnp
from jax import lax
from jax.experimental import pallas as pl
from jax.experimental.pallas import tpu as pltpu

D_MODEL = 32
NUM_HEAD = 4
D_FF = 64
DEPTH = D_MODEL // NUM_HEAD
EPS = 1e-6


def encoder_layer_kernel(x_ref,
                         wqkv_ref, bqkv_ref,          # (D, 3D) bf16, (1, 3D) f32
                         wo3_ref, bo_ref,             # (H, depth, D) bf16, (1, D) f32
                         g1_ref, g2_ref,              # (1, D) f32
                         w12_ref, b12_ref,            # (D, 2*D_FF) bf16, (1, 2*D_FF) f32
                         w3_ref, b3_ref,              # (D_FF, D) bf16, (1, D) f32
                         out_ref):
    BT, S, D = x_ref.shape
    bf16 = jnp.bfloat16

    # Flatten all rows of this batch tile into one (BT*S, D) slab (leading-dim
    # merge: free, no relayout).
    x = x_ref[...].reshape(BT * S, D)                      # f32

    # ---------------- RMSNorm 1 (f32 elementwise) ----------------
    ms = jnp.mean(x * x, axis=-1, keepdims=True)
    xn = x * lax.rsqrt(ms + EPS) * g1_ref[...]             # (BT*S, D)

    # ---------------- fused QKV projection: one (rows,32)@(32,96) ----------------
    qkv = jnp.dot(xn.astype(bf16), wqkv_ref[...],
                  preferred_element_type=jnp.float32) + bqkv_ref[...]   # (rows, 3D)
    q = qkv[:, 0 * D:1 * D]
    k = qkv[:, 1 * D:2 * D]
    v = qkv[:, 2 * D:3 * D]

    # ---------------- multi-head self-attention (no mask) ----------------
    scale = 1.0 / math.sqrt(DEPTH)
    attn_rows = []
    for b in range(BT):                                     # static loop over batch tile
        r0 = b * S
        qb, kb, vb = q[r0:r0 + S], k[r0:r0 + S], v[r0:r0 + S]          # (S, D)
        # (H, S, depth) head-major layout — batched over heads, no kh.T, no concat
        q3 = jnp.stack([qb[:, h * DEPTH:(h + 1) * DEPTH] for h in range(NUM_HEAD)], axis=0)
        k3 = jnp.stack([kb[:, h * DEPTH:(h + 1) * DEPTH] for h in range(NUM_HEAD)], axis=0)
        v3 = jnp.stack([vb[:, h * DEPTH:(h + 1) * DEPTH] for h in range(NUM_HEAD)], axis=0)

        # scores: contract last dims (no transpose materialized)     -> (H, S, S)
        s = lax.dot_general(q3.astype(bf16), k3.astype(bf16),
                            dimension_numbers=(((2,), (2,)), ((0,), (0,))),
                            preferred_element_type=jnp.float32) * scale
        s = s - jnp.max(s, axis=-1, keepdims=True)          # stable softmax (f32)
        p = jnp.exp(s)
        inv_l = pl.reciprocal(jnp.sum(p, axis=-1, keepdims=True), approx=True)  # (H,S,1)

        # PV, normalize on the small (H, S, depth) output instead of (S, S)
        o3 = lax.dot_general(p.astype(bf16), v3.astype(bf16),
                             dimension_numbers=(((2,), (1,)), ((0,), (0,))),
                             preferred_element_type=jnp.float32) * inv_l  # (H,S,depth)

        # output projection, batched per head, then summed over heads:
        #   attn = sum_h o3[h] @ wo[h*depth:(h+1)*depth, :]
        proj = lax.dot_general(o3.astype(bf16), wo3_ref[...],
                               dimension_numbers=(((2,), (1,)), ((0,), (0,))),
                               preferred_element_type=jnp.float32)        # (H, S, D)
        attn_rows.append(jnp.sum(proj, axis=0))                           # (S, D)

    attn = attn_rows[0] if BT == 1 else jnp.concatenate(attn_rows, axis=0)
    attn = attn + bo_ref[...]
    x1 = x + attn                                           # residual 1

    # ---------------- RMSNorm 2 ----------------
    ms2 = jnp.mean(x1 * x1, axis=-1, keepdims=True)
    xn2 = x1 * lax.rsqrt(ms2 + EPS) * g2_ref[...]

    # ---------------- SwiGLU FFN: fused (rows,32)@(32,128) then (rows,64)@(64,32) ----
    h12 = jnp.dot(xn2.astype(bf16), w12_ref[...],
                  preferred_element_type=jnp.float32) + b12_ref[...]      # (rows, 128)
    h1 = h12[:, :D_FF]
    h2 = h12[:, D_FF:]
    # silu with EUP approx reciprocal (exp + vrcp, no full-precision divide)
    h1 = h1 * pl.reciprocal(1.0 + jnp.exp(-h1), approx=True)
    ff = jnp.dot((h1 * h2).astype(bf16), w3_ref[...],
                 preferred_element_type=jnp.float32) + b3_ref[...]        # (rows, D)

    out_ref[...] = (x1 + ff).reshape(BT, S, D)              # residual 2


def encoder_layer(x, params):
    B, S, D = x.shape
    assert D == D_MODEL
    bf16 = jnp.bfloat16

    # Keep >= 2 parallel grid steps when possible (v7x has 2 TensorCores),
    # while each step still processes a full BT*S-row slab.
    num_tiles = 2 if (B >= 2 and B % 2 == 0) else 1
    BT = B // num_tiles

    # -------- pack / pre-cast weights once in the wrapper --------
    wqkv = jnp.concatenate([params["wq"], params["wk"], params["wv"]], axis=1).astype(bf16)
    bqkv = jnp.concatenate([params["bq"], params["bk"], params["bv"]], axis=1)
    wo3 = params["wo"].reshape(NUM_HEAD, DEPTH, D_MODEL).astype(bf16)
    w12 = jnp.concatenate([params["w1"], params["w2"]], axis=1).astype(bf16)
    b12 = jnp.concatenate([params["b1"], params["b2"]], axis=1)
    w3 = params["w3"].astype(bf16)

    args = [x,
            wqkv, bqkv,
            wo3, params["bo"],
            params["g1"], params["g2"],
            w12, b12,
            w3, params["b3"]]

    x_spec = pl.BlockSpec((BT, S, D), lambda t: (t, 0, 0))

    def full_spec(a):
        shape = a.shape
        return pl.BlockSpec(shape, lambda t: tuple(0 for _ in shape))

    in_specs = [x_spec] + [full_spec(a) for a in args[1:]]

    return pl.pallas_call(
        encoder_layer_kernel,
        out_shape=jax.ShapeDtypeStruct((B, S, D), jnp.float32),
        grid_spec=pltpu.PrefetchScalarGridSpec(
            num_scalar_prefetch=0,
            grid=(num_tiles,),
            in_specs=in_specs,
            out_specs=x_spec,
        ),
        compiler_params=pltpu.CompilerParams(
            dimension_semantics=("parallel",)),
    )(*args)


# ---------------- pure-JAX reference (module semantics, f32) ----------------
def reference(x, p):
    def rmsnorm(x, g):
        ms = jnp.mean(x * x, axis=-1, keepdims=True)
        return x * lax.rsqrt(ms + EPS) * g

    xn = rmsnorm(x, p["g1"])
    q = xn @ p["wq"] + p["bq"]
    k = xn @ p["wk"] + p["bk"]
    v = xn @ p["wv"] + p["bv"]
    B, S, D = x.shape

    def split(t):  # (B, S, D) -> (B, H, S, depth)
        return t.reshape(B, S, NUM_HEAD, DEPTH).transpose(0, 2, 1, 3)

    qh, kh, vh = split(q), split(k), split(v)
    s = jnp.einsum("bhqd,bhkd->bhqk", qh, kh) / math.sqrt(DEPTH)
    w = jax.nn.softmax(s, axis=-1)
    a = jnp.einsum("bhqk,bhkd->bhqd", w, vh)
    a = a.transpose(0, 2, 1, 3).reshape(B, S, D)
    attn = a @ p["wo"] + p["bo"]
    x1 = x + attn

    xn2 = rmsnorm(x1, p["g2"])
    h1 = jax.nn.silu(xn2 @ p["w1"] + p["b1"])
    h2 = xn2 @ p["w2"] + p["b2"]
    ff = (h1 * h2) @ p["w3"] + p["b3"]
    return x1 + ff


if __name__ == "__main__":
    key = jax.random.PRNGKey(0)
    keys = jax.random.split(key, 16)

    B, S = 2, 8
    x = jax.random.normal(keys[0], (B, S, D_MODEL), dtype=jnp.float32)

    def lin(k, fan_in, fan_out):
        return 0.05 * jax.random.normal(k, (fan_in, fan_out), dtype=jnp.float32)

    params = {
        "wq": lin(keys[1], D_MODEL, D_MODEL), "bq": 0.01 * jnp.ones((1, D_MODEL), jnp.float32),
        "wk": lin(keys[2], D_MODEL, D_MODEL), "bk": 0.01 * jnp.ones((1, D_MODEL), jnp.float32),
        "wv": lin(keys[3], D_MODEL, D_MODEL), "bv": 0.01 * jnp.ones((1, D_MODEL), jnp.float32),
        "wo": lin(keys[4], D_MODEL, D_MODEL), "bo": 0.01 * jnp.ones((1, D_MODEL), jnp.float32),
        "g1": jnp.ones((1, D_MODEL), jnp.float32),
        "g2": jnp.ones((1, D_MODEL), jnp.float32),
        "w1": lin(keys[5], D_MODEL, D_FF), "b1": 0.01 * jnp.ones((1, D_FF), jnp.float32),
        "w2": lin(keys[6], D_MODEL, D_FF), "b2": 0.01 * jnp.ones((1, D_FF), jnp.float32),
        "w3": lin(keys[7], D_FF, D_MODEL), "b3": 0.01 * jnp.ones((1, D_MODEL), jnp.float32),
    }

    out = encoder_layer(x, params)
    jax.block_until_ready(out)

    ref = reference(x, params)
    assert out.shape == (B, S, D_MODEL)
    # bf16 MXU operands + approx reciprocals vs f32 reference -> loosened tolerance
    assert jnp.allclose(out, ref, atol=2e-2, rtol=2e-2), (
        "mismatch vs reference, max abs diff = %e" % float(jnp.max(jnp.abs(out - ref))))

    print("KERNEL_OK")
</pallas_src>

<mosaic_0001>
module attributes {stable_mosaic.version = 11 : i64} {
  func.func @encoder_layer_kernel(%arg0: i32, %arg1: memref<1x8x32xf32, #tpu.memory_space<vmem>>, %arg2: memref<32x96xbf16, #tpu.memory_space<vmem>>, %arg3: memref<1x96xf32, #tpu.memory_space<vmem>>, %arg4: memref<4x8x32xbf16, #tpu.memory_space<vmem>>, %arg5: memref<1x32xf32, #tpu.memory_space<vmem>>, %arg6: memref<1x32xf32, #tpu.memory_space<vmem>>, %arg7: memref<1x32xf32, #tpu.memory_space<vmem>>, %arg8: memref<32x128xbf16, #tpu.memory_space<vmem>>, %arg9: memref<1x128xf32, #tpu.memory_space<vmem>>, %arg10: memref<64x32xbf16, #tpu.memory_space<vmem>>, %arg11: memref<1x32xf32, #tpu.memory_space<vmem>>, %arg12: memref<1x8x32xf32, #tpu.memory_space<vmem>>) attributes {dimension_semantics = [#tpu.dimension_semantics<parallel>], iteration_bounds = array<i64: 2>, scalar_prefetch = 0 : i64, scratch_operands = 0 : i64, tpu.core_type = #tpu.core_type<tc>, window_params = [{transform_indices = @transform_0, window_bounds = array<i64: 1, 8, 32>}, {pipeline_mode = #tpu.pipeline_mode<synchronous>, transform_indices = @transform_1, window_bounds = array<i64: 32, 96>}, {pipeline_mode = #tpu.pipeline_mode<synchronous>, transform_indices = @transform_2, window_bounds = array<i64: 1, 96>}, {pipeline_mode = #tpu.pipeline_mode<synchronous>, transform_indices = @transform_3, window_bounds = array<i64: 4, 8, 32>}, {pipeline_mode = #tpu.pipeline_mode<synchronous>, transform_indices = @transform_4, window_bounds = array<i64: 1, 32>}, {pipeline_mode = #tpu.pipeline_mode<synchronous>, transform_indices = @transform_5, window_bounds = array<i64: 1, 32>}, {pipeline_mode = #tpu.pipeline_mode<synchronous>, transform_indices = @transform_6, window_bounds = array<i64: 1, 32>}, {pipeline_mode = #tpu.pipeline_mode<synchronous>, transform_indices = @transform_7, window_bounds = array<i64: 32, 128>}, {pipeline_mode = #tpu.pipeline_mode<synchronous>, transform_indices = @transform_8, window_bounds = array<i64: 1, 128>}, {pipeline_mode = #tpu.pipeline_mode<synchronous>, transform_indices = @transform_9, window_bounds = array<i64: 64, 32>}, {pipeline_mode = #tpu.pipeline_mode<synchronous>, transform_indices = @transform_10, window_bounds = array<i64: 1, 32>}, {transform_indices = @transform_11, window_bounds = array<i64: 1, 8, 32>}]} {
    %c0 = arith.constant 0 : index
    %c0_0 = arith.constant 0 : index
    %c0_1 = arith.constant 0 : index
    %0 = vector.load %arg1[%c0, %c0_0, %c0_1] : memref<1x8x32xf32, #tpu.memory_space<vmem>>, vector<1x8x32xf32>
    %1 = vector.shape_cast %0 : vector<1x8x32xf32> to vector<8x32xf32>
    %2 = arith.mulf %1, %1 : vector<8x32xf32>
    %cst = arith.constant dense<0.000000e+00> : vector<8xf32>
    %3 = vector.multi_reduction <add>, %2, %cst [1] : vector<8x32xf32> to vector<8xf32>
    %4 = vector.shape_cast %3 : vector<8xf32> to vector<8x1xf32>
    %cst_2 = arith.constant 3.200000e+01 : f32
    %5 = vector.broadcast %cst_2 : f32 to vector<8x1xf32>
    %6 = arith.divf %4, %5 : vector<8x1xf32>
    %cst_3 = arith.constant 9.99999997E-7 : f32
    %7 = vector.broadcast %cst_3 : f32 to vector<8x1xf32>
    %8 = arith.addf %6, %7 : vector<8x1xf32>
    %9 = math.rsqrt %8 : vector<8x1xf32>
    %10 = vector.broadcast %9 : vector<8x1xf32> to vector<8x32xf32>
    %11 = arith.mulf %1, %10 : vector<8x32xf32>
    %c0_4 = arith.constant 0 : index
    %c0_5 = arith.constant 0 : index
    %12 = vector.load %arg6[%c0_4, %c0_5] : memref<1x32xf32, #tpu.memory_space<vmem>>, vector<1x32xf32>
    %13 = vector.broadcast %12 : vector<1x32xf32> to vector<8x32xf32>
    %14 = arith.mulf %11, %13 : vector<8x32xf32>
    %15 = arith.truncf %14 : vector<8x32xf32> to vector<8x32xbf16>
    %c0_6 = arith.constant 0 : index
    %c0_7 = arith.constant 0 : index
    %16 = vector.load %arg2[%c0_6, %c0_7] : memref<32x96xbf16, #tpu.memory_space<vmem>>, vector<32x96xbf16>
    %cst_8 = arith.constant dense<0.000000e+00> : vector<8x96xf32>
    %17 = tpu.matmul %15, %16, %cst_8 {dimension_numbers = #tpu.dot_dimension_numbers<[1], [0], [0], [1], [0, 0, 1, 1], [], []>} : vector<8x32xbf16>, vector<32x96xbf16>, vector<8x96xf32> -> vector<8x96xf32>
    %c0_9 = arith.constant 0 : index
    %c0_10 = arith.constant 0 : index
    %18 = vector.load %arg3[%c0_9, %c0_10] : memref<1x96xf32, #tpu.memory_space<vmem>>, vector<1x96xf32>
    %19 = vector.broadcast %18 : vector<1x96xf32> to vector<8x96xf32>
    %20 = arith.addf %17, %19 : vector<8x96xf32>
    %21 = vector.extract_strided_slice %20 {offsets = [0, 0], sizes = [8, 32], strides = [1, 1]} : vector<8x96xf32> to vector<8x32xf32>
    %22 = vector.extract_strided_slice %20 {offsets = [0, 32], sizes = [8, 32], strides = [1, 1]} : vector<8x96xf32> to vector<8x32xf32>
    %23 = vector.extract_strided_slice %20 {offsets = [0, 64], sizes = [8, 32], strides = [1, 1]} : vector<8x96xf32> to vector<8x32xf32>
    %24 = vector.extract_strided_slice %21 {offsets = [0, 0], sizes = [8, 8], strides = [1, 1]} : vector<8x32xf32> to vector<8x8xf32>
    %25 = vector.extract_strided_slice %21 {offsets = [0, 8], sizes = [8, 8], strides = [1, 1]} : vector<8x32xf32> to vector<8x8xf32>
    %26 = vector.extract_strided_slice %21 {offsets = [0, 16], sizes = [8, 8], strides = [1, 1]} : vector<8x32xf32> to vector<8x8xf32>
    %27 = vector.extract_strided_slice %21 {offsets = [0, 24], sizes = [8, 8], strides = [1, 1]} : vector<8x32xf32> to vector<8x8xf32>
    %28 = vector.shape_cast %24 : vector<8x8xf32> to vector<1x8x8xf32>
    %29 = vector.shape_cast %25 : vector<8x8xf32> to vector<1x8x8xf32>
    %30 = vector.shape_cast %26 : vector<8x8xf32> to vector<1x8x8xf32>
    %31 = vector.shape_cast %27 : vector<8x8xf32> to vector<1x8x8xf32>
    %32 = tpu.concatenate %28, %29, %30, %31 in 0 : vector<1x8x8xf32>, vector<1x8x8xf32>, vector<1x8x8xf32>, vector<1x8x8xf32> -> vector<4x8x8xf32>
    %33 = vector.extract_strided_slice %22 {offsets = [0, 0], sizes = [8, 8], strides = [1, 1]} : vector<8x32xf32> to vector<8x8xf32>
    %34 = vector.extract_strided_slice %22 {offsets = [0, 8], sizes = [8, 8], strides = [1, 1]} : vector<8x32xf32> to vector<8x8xf32>
    %35 = vector.extract_strided_slice %22 {offsets = [0, 16], sizes = [8, 8], strides = [1, 1]} : vector<8x32xf32> to vector<8x8xf32>
    %36 = vector.extract_strided_slice %22 {offsets = [0, 24], sizes = [8, 8], strides = [1, 1]} : vector<8x32xf32> to vector<8x8xf32>
    %37 = vector.shape_cast %33 : vector<8x8xf32> to vector<1x8x8xf32>
    %38 = vector.shape_cast %34 : vector<8x8xf32> to vector<1x8x8xf32>
    %39 = vector.shape_cast %35 : vector<8x8xf32> to vector<1x8x8xf32>
    %40 = vector.shape_cast %36 : vector<8x8xf32> to vector<1x8x8xf32>
    %41 = tpu.concatenate %37, %38, %39, %40 in 0 : vector<1x8x8xf32>, vector<1x8x8xf32>, vector<1x8x8xf32>, vector<1x8x8xf32> -> vector<4x8x8xf32>
    %42 = vector.extract_strided_slice %23 {offsets = [0, 0], sizes = [8, 8], strides = [1, 1]} : vector<8x32xf32> to vector<8x8xf32>
    %43 = vector.extract_strided_slice %23 {offsets = [0, 8], sizes = [8, 8], strides = [1, 1]} : vector<8x32xf32> to vector<8x8xf32>
    %44 = vector.extract_strided_slice %23 {offsets = [0, 16], sizes = [8, 8], strides = [1, 1]} : vector<8x32xf32> to vector<8x8xf32>
    %45 = vector.extract_strided_slice %23 {offsets = [0, 24], sizes = [8, 8], strides = [1, 1]} : vector<8x32xf32> to vector<8x8xf32>
    %46 = vector.shape_cast %42 : vector<8x8xf32> to vector<1x8x8xf32>
    %47 = vector.shape_cast %43 : vector<8x8xf32> to vector<1x8x8xf32>
    %48 = vector.shape_cast %44 : vector<8x8xf32> to vector<1x8x8xf32>
    %49 = vector.shape_cast %45 : vector<8x8xf32> to vector<1x8x8xf32>
    %50 = tpu.concatenate %46, %47, %48, %49 in 0 : vector<1x8x8xf32>, vector<1x8x8xf32>, vector<1x8x8xf32>, vector<1x8x8xf32> -> vector<4x8x8xf32>
    %51 = arith.truncf %32 : vector<4x8x8xf32> to vector<4x8x8xbf16>
    %52 = arith.truncf %41 : vector<4x8x8xf32> to vector<4x8x8xbf16>
    %cst_11 = arith.constant dense<0.000000e+00> : vector<4x8x8xf32>
    %53 = tpu.matmul %51, %52, %cst_11 {dimension_numbers = #tpu.dot_dimension_numbers<[2], [2], [1], [1], [0, 0, 0, 1, 1, 1], [0], [0]>} : vector<4x8x8xbf16>, vector<4x8x8xbf16>, vector<4x8x8xf32> -> vector<4x8x8xf32>
    %cst_12 = arith.constant 0.353553385 : f32
    %54 = vector.broadcast %cst_12 : f32 to vector<4x8x8xf32>
    %55 = arith.mulf %53, %54 : vector<4x8x8xf32>
    %cst_13 = arith.constant dense<0xFF800000> : vector<4x8xf32>
    %56 = vector.multi_reduction <maximumf>, %55, %cst_13 [2] : vector<4x8x8xf32> to vector<4x8xf32>
    %57 = vector.shape_cast %56 : vector<4x8xf32> to vector<4x8x1xf32>
    %58 = vector.broadcast %57 : vector<4x8x1xf32> to vector<4x8x8xf32>
    %59 = arith.subf %55, %58 : vector<4x8x8xf32>
    %60 = math.exp %59 : vector<4x8x8xf32>
    %cst_14 = arith.constant dense<0.000000e+00> : vector<4x8xf32>
    %61 = vector.multi_reduction <add>, %60, %cst_14 [2] : vector<4x8x8xf32> to vector<4x8xf32>
    %62 = vector.shape_cast %61 : vector<4x8xf32> to vector<4x8x1xf32>
    %63 = tpu.reciprocal %62 {approx = true} : vector<4x8x1xf32> -> vector<4x8x1xf32>
    %64 = arith.truncf %60 : vector<4x8x8xf32> to vector<4x8x8xbf16>
    %65 = arith.truncf %50 : vector<4x8x8xf32> to vector<4x8x8xbf16>
    %cst_15 = arith.constant dense<0.000000e+00> : vector<4x8x8xf32>
    %66 = tpu.matmul %64, %65, %cst_15 {dimension_numbers = #tpu.dot_dimension_numbers<[2], [1], [1], [2], [0, 0, 0, 1, 1, 2], [0], [0]>} : vector<4x8x8xbf16>, vector<4x8x8xbf16>, vector<4x8x8xf32> -> vector<4x8x8xf32>
    %67 = vector.broadcast %63 : vector<4x8x1xf32> to vector<4x8x8xf32>
    %68 = arith.mulf %66, %67 : vector<4x8x8xf32>
    %69 = arith.truncf %68 : vector<4x8x8xf32> to vector<4x8x8xbf16>
    %c0_16 = arith.constant 0 : index
    %c0_17 = arith.constant 0 : index
    %c0_18 = arith.constant 0 : index
    %70 = vector.load %arg4[%c0_16, %c0_17, %c0_18] : memref<4x8x32xbf16, #tpu.memory_space<vmem>>, vector<4x8x32xbf16>
    %cst_19 = arith.constant dense<0.000000e+00> : vector<4x8x32xf32>
    %71 = tpu.matmul %69, %70, %cst_19 {dimension_numbers = #tpu.dot_dimension_numbers<[2], [1], [1], [2], [0, 0, 0, 1, 1, 2], [0], [0]>} : vector<4x8x8xbf16>, vector<4x8x32xbf16>, vector<4x8x32xf32> -> vector<4x8x32xf32>
    %cst_20 = arith.constant dense<0.000000e+00> : vector<8x32xf32>
    %72 = vector.multi_reduction <add>, %71, %cst_20 [0] : vector<4x8x32xf32> to vector<8x32xf32>
    %c0_21 = arith.constant 0 : index
    %c0_22 = arith.constant 0 : index
    %73 = vector.load %arg5[%c0_21, %c0_22] : memref<1x32xf32, #tpu.memory_space<vmem>>, vector<1x32xf32>
    %74 = vector.broadcast %73 : vector<1x32xf32> to vector<8x32xf32>
    %75 = arith.addf %72, %74 : vector<8x32xf32>
    %76 = arith.addf %1, %75 : vector<8x32xf32>
    %77 = arith.mulf %76, %76 : vector<8x32xf32>
    %cst_23 = arith.constant dense<0.000000e+00> : vector<8xf32>
    %78 = vector.multi_reduction <add>, %77, %cst_23 [1] : vector<8x32xf32> to vector<8xf32>
    %79 = vector.shape_cast %78 : vector<8xf32> to vector<8x1xf32>
    %cst_24 = arith.constant 3.200000e+01 : f32
    %80 = vector.broadcast %cst_24 : f32 to vector<8x1xf32>
    %81 = arith.divf %79, %80 : vector<8x1xf32>
    %cst_25 = arith.constant 9.99999997E-7 : f32
    %82 = vector.broadcast %cst_25 : f32 to vector<8x1xf32>
    %83 = arith.addf %81, %82 : vector<8x1xf32>
    %84 = math.rsqrt %83 : vector<8x1xf32>
    %85 = vector.broadcast %84 : vector<8x1xf32> to vector<8x32xf32>
    %86 = arith.mulf %76, %85 : vector<8x32xf32>
    %c0_26 = arith.constant 0 : index
    %c0_27 = arith.constant 0 : index
    %87 = vector.load %arg7[%c0_26, %c0_27] : memref<1x32xf32, #tpu.memory_space<vmem>>, vector<1x32xf32>
    %88 = vector.broadcast %87 : vector<1x32xf32> to vector<8x32xf32>
    %89 = arith.mulf %86, %88 : vector<8x32xf32>
    %90 = arith.truncf %89 : vector<8x32xf32> to vector<8x32xbf16>
    %c0_28 = arith.constant 0 : index
    %c0_29 = arith.constant 0 : index
    %91 = vector.load %arg8[%c0_28, %c0_29] : memref<32x128xbf16, #tpu.memory_space<vmem>>, vector<32x128xbf16>
    %cst_30 = arith.constant dense<0.000000e+00> : vector<8x128xf32>
    %92 = tpu.matmul %90, %91, %cst_30 {dimension_numbers = #tpu.dot_dimension_numbers<[1], [0], [0], [1], [0, 0, 1, 1], [], []>} : vector<8x32xbf16>, vector<32x128xbf16>, vector<8x128xf32> -> vector<8x128xf32>
    %c0_31 = arith.constant 0 : index
    %c0_32 = arith.constant 0 : index
    %93 = vector.load %arg9[%c0_31, %c0_32] : memref<1x128xf32, #tpu.memory_space<vmem>>, vector<1x128xf32>
    %94 = vector.broadcast %93 : vector<1x128xf32> to vector<8x128xf32>
    %95 = arith.addf %92, %94 : vector<8x128xf32>
    %96 = vector.extract_strided_slice %95 {offsets = [0, 0], sizes = [8, 64], strides = [1, 1]} : vector<8x128xf32> to vector<8x64xf32>
    %97 = vector.extract_strided_slice %95 {offsets = [0, 64], sizes = [8, 64], strides = [1, 1]} : vector<8x128xf32> to vector<8x64xf32>
    %cst_33 = arith.constant 0.000000e+00 : f32
    %98 = vector.broadcast %cst_33 : f32 to vector<8x64xf32>
    %99 = arith.subf %98, %96 : vector<8x64xf32>
    %100 = math.exp %99 : vector<8x64xf32>
    %cst_34 = arith.constant 1.000000e+00 : f32
    %101 = vector.broadcast %cst_34 : f32 to vector<8x64xf32>
    %102 = arith.addf %101, %100 : vector<8x64xf32>
    %103 = tpu.reciprocal %102 {approx = true} : vector<8x64xf32> -> vector<8x64xf32>
    %104 = arith.mulf %96, %103 : vector<8x64xf32>
    %105 = arith.mulf %104, %97 : vector<8x64xf32>
    %106 = arith.truncf %105 : vector<8x64xf32> to vector<8x64xbf16>
    %c0_35 = arith.constant 0 : index
    %c0_36 = arith.constant 0 : index
    %107 = vector.load %arg10[%c0_35, %c0_36] : memref<64x32xbf16, #tpu.memory_space<vmem>>, vector<64x32xbf16>
    %cst_37 = arith.constant dense<0.000000e+00> : vector<8x32xf32>
    %108 = tpu.matmul %106, %107, %cst_37 {dimension_numbers = #tpu.dot_dimension_numbers<[1], [0], [0], [1], [0, 0, 1, 1], [], []>} : vector<8x64xbf16>, vector<64x32xbf16>, vector<8x32xf32> -> vector<8x32xf32>
    %c0_38 = arith.constant 0 : index
    %c0_39 = arith.constant 0 : index
    %109 = vector.load %arg11[%c0_38, %c0_39] : memref<1x32xf32, #tpu.memory_space<vmem>>, vector<1x32xf32>
    %110 = vector.broadcast %109 : vector<1x32xf32> to vector<8x32xf32>
    %111 = arith.addf %108, %110 : vector<8x32xf32>
    %112 = arith.addf %76, %111 : vector<8x32xf32>
    %113 = vector.shape_cast %112 : vector<8x32xf32> to vector<1x8x32xf32>
    %c0_40 = arith.constant 0 : index
    %c0_41 = arith.constant 0 : index
    %c0_42 = arith.constant 0 : index
    %114 = vector.load %arg12[%c0_40, %c0_41, %c0_42] : memref<1x8x32xf32, #tpu.memory_space<vmem>>, vector<1x8x32xf32>
    tpu.vector_store %arg12[%c0_40, %c0_41, %c0_42], %113 {strides = array<i32>} : memref<1x8x32xf32, #tpu.memory_space<vmem>>, vector<1x8x32xf32>,
    return
  }
  func.func @transform_0(%arg0: i32) -> (i32, i32, i32) {
    %c0_i32 = arith.constant 0 : i32
    %c0_i32_0 = arith.constant 0 : i32
    %c0_i32_1 = arith.constant 0 : i32
    return %arg0, %c0_i32, %c0_i32_0 : i32, i32, i32
  }
  func.func @transform_1(%arg0: i32) -> (i32, i32) {
    %c0_i32 = arith.constant 0 : i32
    %c0_i32_0 = arith.constant 0 : i32
    %c0_i32_1 = arith.constant 0 : i32
    return %c0_i32, %c0_i32_0 : i32, i32
  }
  func.func @transform_2(%arg0: i32) -> (i32, i32) {
    %c0_i32 = arith.constant 0 : i32
    %c0_i32_0 = arith.constant 0 : i32
    %c0_i32_1 = arith.constant 0 : i32
    return %c0_i32, %c0_i32_0 : i32, i32
  }
  func.func @transform_3(%arg0: i32) -> (i32, i32, i32) {
    %c0_i32 = arith.constant 0 : i32
    %c0_i32_0 = arith.constant 0 : i32
    %c0_i32_1 = arith.constant 0 : i32
    %c0_i32_2 = arith.constant 0 : i32
    return %c0_i32, %c0_i32_0, %c0_i32_1 : i32, i32, i32
  }
  func.func @transform_4(%arg0: i32) -> (i32, i32) {
    %c0_i32 = arith.constant 0 : i32
    %c0_i32_0 = arith.constant 0 : i32
    %c0_i32_1 = arith.constant 0 : i32
    return %c0_i32, %c0_i32_0 : i32, i32
  }
  func.func @transform_5(%arg0: i32) -> (i32, i32) {
    %c0_i32 = arith.constant 0 : i32
    %c0_i32_0 = arith.constant 0 : i32
    %c0_i32_1 = arith.constant 0 : i32
    return %c0_i32, %c0_i32_0 : i32, i32
  }
  func.func @transform_6(%arg0: i32) -> (i32, i32) {
    %c0_i32 = arith.constant 0 : i32
    %c0_i32_0 = arith.constant 0 : i32
    %c0_i32_1 = arith.constant 0 : i32
    return %c0_i32, %c0_i32_0 : i32, i32
  }
  func.func @transform_7(%arg0: i32) -> (i32, i32) {
    %c0_i32 = arith.constant 0 : i32
    %c0_i32_0 = arith.constant 0 : i32
    %c0_i32_1 = arith.constant 0 : i32
    return %c0_i32, %c0_i32_0 : i32, i32
  }
  func.func @transform_8(%arg0: i32) -> (i32, i32) {
    %c0_i32 = arith.constant 0 : i32
    %c0_i32_0 = arith.constant 0 : i32
    %c0_i32_1 = arith.constant 0 : i32
    return %c0_i32, %c0_i32_0 : i32, i32
  }
  func.func @transform_9(%arg0: i32) -> (i32, i32) {
    %c0_i32 = arith.constant 0 : i32
    %c0_i32_0 = arith.constant 0 : i32
    %c0_i32_1 = arith.constant 0 : i32
    return %c0_i32, %c0_i32_0 : i32, i32
  }
  func.func @transform_10(%arg0: i32) -> (i32, i32) {
    %c0_i32 = arith.constant 0 : i32
    %c0_i32_0 = arith.constant 0 : i32
    %c0_i32_1 = arith.constant 0 : i32
    return %c0_i32, %c0_i32_0 : i32, i32
  }
  func.func @transform_11(%arg0: i32) -> (i32, i32, i32) {
    %c0_i32 = arith.constant 0 : i32
    %c0_i32_0 = arith.constant 0 : i32
    %c0_i32_1 = arith.constant 0 : i32
    return %arg0, %c0_i32, %c0_i32_0 : i32, i32, i32
  }
}

</mosaic_0001>

<bundles_post_ra>
// kernel: tpu_custom_call.1
= control target key start
LH: loop header
LB: loop body
LE: loop exit
PB: predicated region body
PF: predicated region fallthrough
CT: control target
= control target key end

     0   :  { %s2492_s0 = inlined_call_operand.vmem [shape: f32[2,8,32], index: 0, kind: input, shape index: {}]   ;;  %s2493_s1 = inlined_call_operand.vmem [shape: bf16[32,96], index: 1, kind: input, shape index: {}]   ;;  %s2494_s2 = inlined_call_operand.hbm [shape: f32[1,96], index: 2, kind: input, shape index: {}]   ;;  %s2495_s3 = inlined_call_operand.vmem [shape: bf16[4,8,32], index: 3, kind: input, shape index: {}]   ;;  %s2496_s4 = inlined_call_operand.hbm [shape: f32[1,32], index: 4, kind: input, shape index: {}]   ;;  %s2497_s5 = inlined_call_operand.hbm [shape: f32[1,32], index: 5, kind: input, shape index: {}]   ;;  %s2498_s6 = inlined_call_operand.hbm [shape: f32[1,32], index: 6, kind: input, shape index: {}]   ;;  %s2499_s7 = inlined_call_operand.hbm [shape: bf16[32,128], index: 7, kind: input, shape index: {}]   ;;  %s2500_s8 = inlined_call_operand.hbm [shape: f32[1,128], index: 8, kind: input, shape index: {}]   ;;  %s2501_s9 = inlined_call_operand.vmem [shape: bf16[64,32], index: 9, kind: input, shape index: {}]   ;;  %s2502_s10 = inlined_call_operand.vmem [shape: f32[1,32], index: 10, kind: input, shape index: {}]   ;;  %s2503_s11 = inlined_call_operand.hbm [shape: f32[2,8,32], index: 11, kind: output, shape index: {}]  }
   0x1   :  { %2508 = sst [smem:[#allocation21_spill]] %s2494_s2 }
   0x2   :  { %2509 = sst [smem:[#allocation22_spill]] %s2496_s4 }
   0x3   :  { %16 = vsyncpa [#allocation3], 0 }
   0x4   :  { %17 = vsyncpa [#allocation6], 0 }
   0x5   :  { %18 = vsyncpa [#allocation9], 0 }
   0x6   :  { %19 = vsyncpa [#allocation12], 0 }
   0x7   :  { %20 = vsyncpa [#allocation4], 0 }
   0x8   :  { %22 = vsyncpa [#allocation4 + $0x1], 0  ;;  %s2161_s17 = smov 0   ;;  %s2163_s18 = smov 0  }
   0x9   :  { %s2165_s19 = smov 0   ;;  %s2167_s20 = smov 0  }
   0xa LB: > { %2510 = sst [smem:[#allocation19_spill]] %s2079_s19  ;;  %s2182_s21 = sadd.s32 4294967295, %s2083_s20   ;;  %s2083_s20 = sphi %s2167_s20, %s2534_s20   ;;  %s2079_s19 = sphi %s2165_s19, %s2531_s19   ;;  %s2075_s18 = sphi %s2163_s18, %s2533_s18   ;;  %s2071_s17 = sphi %s2161_s17, %s2532_s17  }
   0xb   : > { %s1524_s22 = sadd.s32 4294967294, %s2083_s20   ;;  %s2186_s23 = sadd.s32 1, %s2083_s20  }
   0xc   : > { %s271_s24 = sadd.s32 1, %s2079_s19  ;;  %s268_s25 = ssub.s32 %s2083_s20, %s2186_s23 }
   0xd   : > { %p281_p0 = scmp.ne.s32.totalorder %s2079_s19, %s2075_s18  ;;  %p269_p1 = scmp.eq.s32.totalorder %s268_s25, 0 }
   0xe   : > { %p282_p2 = scmp.eq.s32.totalorder %s2182_s21, 1  ;;  %p287_p3 = scmp.ne.s32.totalorder %s2075_s18, %s2071_s17 }
   0xf   : > { %p288_p4 = scmp.eq.s32.totalorder %s1524_s22, 1  ;;  %p1525_p7 = scmp.ge.s32.totalorder %s2083_s20, 1 }
  0x10   : > { %s2197_s26 = scalar_select %p269_p1, %s2079_s19, %s271_s24  }
  0x11   : > { %p2199_p5 = por %p282_p2, %p281_p0  ;;  %p2203_p6 = por %p288_p4, %p287_p3 }
  0x12   : > { %2511 = sst [smem:[#allocation20_spill]] %s2197_s26  ;;  %p295_p8 = scmp.lt.s32.totalorder %s2083_s20, 3 }
  0x13   : > { %s2512_s27 = scalar_select %p2199_p5, 1, 0 }
  0x14   : > { %s2513_s28 = scalar_select %p2203_p6, 1, 0 }
  0x15   : > { %p2504_p9 = scmp.eq.s32.totalorder %s2182_s21, 0  ;;  %p2210_p10 = pnand %p1525_p7, %p295_p8 }
  0x16   : > { %s2085_s30 = smov [#allocation5]   ;;  %s2086_s13 = smov [#allocation8]  }
  0x17   : > { %s2514_s29 = scalar_select %p2210_p10, 1, 0 }
  0x18   : > { %s325_s12 = sshll.u32 %s2085_s30, 4  ;;  %p1736_p11 = pneg %p2210_p10  ;;  %s326_s12 = int_to_ptr.vmem [resolvable:$true] %s325_s12 }
  0x19   : > { %s347_s14 = sshll.u32 %s2086_s13, 4  ;;  %s2087_s16 = smov [#allocation2]   ;;  %s348_s14 = int_to_ptr.vmem [resolvable:$true] %s347_s14 }
  0x1a   : > { %p2218_p12 = pnand %p2504_p9, %p1736_p11  ;;  %s311_s22 = sshll.u32 %s2087_s16, 4  ;;  %s2222_s22 = int_to_ptr.vmem [resolvable:$true] %s311_s22 }
  0x1b   : > { %s1862_s25 = scalar_lea.vmem %s326_s12, 16  ;;  %s1869_s30 = scalar_lea.vmem %s326_s12, 32 }
  0x1c   : > { %p2226_p13 = pneg %p2218_p12  ;;  %p1863_p0 = scmp.ne.s32.totalorder %s326_s12, %s1862_s25 }
  0x1d   : > { %p1870_p3 = scmp.lt.s32.totalorder %s326_s12, %s326_s12  ;;  %p1871_p4 = scmp.lt.s32.totalorder %s1869_s30, %s1862_s25 }
  0x1e   : > { %p1865_p1 = pnand %p1863_p0, %p2226_p13 }
  0x1f   : > { %p1872_p7 = por %p1871_p4, %p1870_p3 }
  0x20   : > { %p1866_p2 = pneg %p1865_p1 }
  0x22   : > { %p1873_p8 = pnand %p1872_p7, %p1866_p2 }
  0x24   : > { %1876 = shalt.err (!%p1873_p8)
}
  0x25   : > { %s2517_s4 = sld [smem:[#allocation22_spill]]  ;;  %s1888_s26 = scalar_lea.vmem %s348_s14, 16 }
  0x26   : > { %p1889_p11 = scmp.ne.s32.totalorder %s348_s14, %s1888_s26  ;;  %s1895_s19 = scalar_lea.vmem %s348_s14, 32 }
  0x27   : > { %p1896_p0 = scmp.lt.s32.totalorder %s348_s14, %s348_s14  ;;  %p1897_p1 = scmp.lt.s32.totalorder %s1895_s19, %s1888_s26 }
  0x28   : > { %p1891_p9 = pnand %p1889_p11, %p2226_p13 }
  0x29   : > { %p1898_p5 = por %p1897_p1, %p1896_p0 }
  0x2a   : > { %p1892_p6 = pneg %p1891_p9 }
  0x2b   : > { %1742 = dma.hbm_to_vmem [thread:$0]  (!%p2218_p12), %s2517_s4, 16, %s326_s12, [#allocation6]  }
  0x2c   : > { %p1899_p10 = pnand %p1898_p5, %p1892_p6 }
  0x2e   : > { %1902 = shalt.err (!%p1899_p10)
}
  0x2f   : > { %1748 = dma.hbm_to_vmem [thread:$0]  (!%p2218_p12), %s2498_s6, 16, %s348_s14, [#allocation9]  }
  0x30   : > { %s1914_s12 = scalar_lea.vmem %s2222_s22, 16  ;;  %s1921_s19 = scalar_lea.vmem %s2222_s22, 32 }
  0x31   : > { %p1915_p2 = scmp.ne.s32.totalorder %s2222_s22, %s1914_s12  ;;  %p1922_p5 = scmp.lt.s32.totalorder %s2222_s22, %s2222_s22 }
  0x32   : > { %p1923_p6 = scmp.lt.s32.totalorder %s1921_s19, %s1914_s12 }
  0x33   : > { %p1917_p9 = pnand %p1915_p2, %p2226_p13 }
  0x34   : > { %p1924_p10 = por %p1923_p6, %p1922_p5 }
  0x35   : > { %p1918_p3 = pneg %p1917_p9 }
  0x37   : > { %p1925_p4 = pnand %p1924_p10, %p1918_p3 }
  0x39   : > { %1928 = shalt.err (!%p1925_p4)
}
  0x3a   : > { %s2518_s2 = sld [smem:[#allocation21_spill]]  ;;  %s2088_s14 = smov [#allocation7]  }
  0x3b   : > { %s336_s16 = sshll.u32 %s2088_s14, 4  ;;  %s2089_s25 = smov [#allocation10]   ;;  %s337_s16 = int_to_ptr.vmem [resolvable:$true] %s336_s16 }
  0x3c   : > { %s357_s30 = sshll.u32 %s2089_s25, 4  ;;  %s1940_s4 = scalar_lea.vmem %s337_s16, 16  ;;  %s358_s30 = int_to_ptr.vmem [resolvable:$true] %s357_s30 }
  0x3d   : > { %p1941_p7 = scmp.ne.s32.totalorder %s337_s16, %s1940_s4  ;;  %s1947_s12 = scalar_lea.vmem %s337_s16, 32 }
  0x3e   : > { %p1948_p0 = scmp.lt.s32.totalorder %s337_s16, %s337_s16  ;;  %p1949_p1 = scmp.lt.s32.totalorder %s1947_s12, %s1940_s4 }
  0x3f   : > { %p1943_p8 = pnand %p1941_p7, %p2226_p13 }
  0x40   : > { %1739 = dma.hbm_to_vmem [thread:$0]  (!%p2218_p12), %s2518_s2, 16, %s2222_s22, [#allocation3]  }
  0x41   : > { %p1944_p11 = pneg %p1943_p8  ;;  %p1950_p2 = por %p1949_p1, %p1948_p0 }
  0x43   : > { %p1951_p9 = pnand %p1950_p2, %p1944_p11 }
  0x45   : > { %1954 = shalt.err (!%p1951_p9)
}
  0x46   : > { %1745 = dma.hbm_to_vmem [thread:$0]  (!%p2218_p12), %s2497_s5, 16, %s337_s16, [#allocation6]  }
  0x47   : > { %s1966_s26 = scalar_lea.vmem %s358_s30, 256  ;;  %p1974_p10 = scmp.lt.s32.totalorder %s358_s30, %s358_s30 }
  0x48   : > { %p1967_p3 = scmp.ne.s32.totalorder %s358_s30, %s1966_s26  ;;  %p1975_p4 = scmp.lt.s32.totalorder %s1966_s26, %s1966_s26 }
  0x4a   : > { %p1969_p5 = pnand %p1967_p3, %p2226_p13  ;;  %p1976_p7 = por %p1975_p4, %p1974_p10 }
  0x4c   : > { %p1970_p6 = pneg %p1969_p5 }
  0x4e   : > { %p1977_p8 = pnand %p1976_p7, %p1970_p6 }
  0x50   : > { %1980 = shalt.err (!%p1977_p8)
}
  0x51   : > { %s2090_s4 = smov 64   ;;  %s2091_s13 = smov 4  }
  0x52   : > { %1751 = dma.hbm_to_vmem [thread:$0]  (!%p2218_p12), %s2499_s7, 256, %s358_s30, [#allocation9], %s2090_s4, %s2090_s4, %s2091_s13  }
  0x53   : > { %s2092_s16 = smov [#allocation11]  }
  0x54   : > { %s371_s12 = sshll.u32 %s2092_s16, 4  ;;  %s372_s12 = int_to_ptr.vmem [resolvable:$true] %s371_s12 }
  0x55   : > { %s1992_s19 = scalar_lea.vmem %s372_s12, 16  ;;  %s1999_s22 = scalar_lea.vmem %s372_s12, 32 }
  0x56   : > { %p1993_p11 = scmp.ne.s32.totalorder %s372_s12, %s1992_s19  ;;  %p2000_p2 = scmp.lt.s32.totalorder %s372_s12, %s372_s12 }
  0x57   : > { %p2001_p9 = scmp.lt.s32.totalorder %s1999_s22, %s1992_s19 }
  0x58   : > { %p1995_p0 = pnand %p1993_p11, %p2226_p13 }
  0x59   : > { %p2002_p3 = por %p2001_p9, %p2000_p2 }
  0x5a   : > { %p1996_p1 = pneg %p1995_p0 }
  0x5c   : > { %p2003_p5 = pnand %p2002_p3, %p1996_p1 }
  0x5e   : > { %2006 = shalt.err (!%p2003_p5)
}
  0x5f   : > { %1754 = dma.hbm_to_vmem [thread:$0]  (!%p2218_p12), %s2500_s8, 16, %s372_s12, [#allocation12]  }
  0x60   : > { %p2519_p6 = scmp.ne.s32.totalorder %s2514_s29, 0 }
  0x61   : > { %p2520_p10 = scmp.eq.s32.totalorder (!%p2519_p6), %s2182_s21, 0 }
  0x62   : > { %397 = sbr.rel (%p2519_p6) target bundleno = 2216 (0x8a8), region = 64 }
  0x67   : > { %2050 = dma.done.wait (%p2520_p10), [#allocation3], 16   ;;  %p2521_p13 = pmov %p2520_p10 }
  0x68   : > { %p2522_p4 = pmov %p2520_p10 }
  0x69   : > { %2052 = vsyncadd (%p2521_p13), [#allocation3], 4294967280 }
  0x6a   : > { %2054 = dma.done.wait (%p2522_p4), [#allocation6], 32   ;;  %p2523_p7 = pmov %p2522_p4 }
  0x6b   : > { %p2524_p8 = pmov %p2522_p4 }
  0x6c   : > { %2056 = vsyncadd (%p2523_p7), [#allocation6], 4294967264 }
  0x6d   : > { %2058 = dma.done.wait (%p2524_p8), [#allocation9], 272   ;;  %p2525_p12 = pmov %p2522_p4 }
  0x6e   : > { %p2526_p11 = pmov %p2522_p4 }
  0x6f   : > { %2060 = vsyncadd (%p2525_p12), [#allocation9], 4294967024 }
  0x70   : > { %2062 = dma.done.wait (%p2526_p11), [#allocation12], 16   ;;  %p2527_p0 = pmov %p2522_p4 }
  0x71   : > { %p456_p1 = scmp.lt.s32.totalorder %s2182_s21, 1  ;;  %vm463_vm0 = vcmask 261120   ;;  %v1819_v3 = vld [vmem:[%s2493_s1 + $0x8] sm:$0xff]   ;;  %v2093_v4 = vmov 0.0   ;;  %vm2094_vm1 = vmmov 0   ;;  %v1820_v5 = vld [vmem:[%s2493_s1] sm:$0xff]  }
  0x72   : > { %2064 = vsyncadd (%p2527_p0), [#allocation12], 4294967280  ;;  %1610 = vmatprep.subr.bf16.mxu1 %v2093_v4  ;;  %1614 = vmatprep.mubr.msk.bf16.mxu1 %vm2094_vm1, %v2093_v4  ;;  %v1542_v10 = vld [vmem:[#allocation7] ss:$0 sm:$0xff]  ;;  %v1543_v14 = vld [vmem:[#allocation2] ss:$0 sm:$0xff] }
  0x73   : > { %s457_s2 = scalar_select %p456_p1, %s2182_s21, 1  ;;  %1611 = vmatpush3.bf16.msra.mxu1 %v1819_v3  ;;  %1624 = vmatprep.subr.bf16.mxu0 %v2093_v4  ;;  %vm564_vm2 = vcmask 64512   ;;  %vm811_vm3 = vcmask 1043456   ;;  %vm1345_vm4 = vcmask 523264  }
  0x74   : > { %1612 = vmatprep.subr.bf16.mxu1 %v2093_v4  ;;  %1626 = vmatprep.mubr.msk.bf16.mxu0 %vm2094_vm1, %v2093_v4  ;;  %s2095_s16 = smov 112   ;;  %s2096_s12 = smov 120  }
  0x75   : > { %s1541_s29 = sshll.u32 %s457_s2, 3  ;;  %s2097_s19 = smov 104  }
  0x76   : > { %s459_s30 = scalar_lea.vmem %s2492_s0, %s1541_s29  ;;  %s2098_s22 = smov 96  }
  0x77   : > { %v2301_v0 = vld [vmem:[%s459_s30] sm:$0xff]  ;;  %1613 = vmatpush3.bf16.msra.mxu1 %v1820_v5  ;;  %s2099_s26 = smov 64   ;;  %s453_s24 = sand.u32 1, %s2075_s18  }
  0x78   : > { %v462_v1 = vmul.f32 %v2301_v0, %v2301_v0  ;;  %1618 = vmatprep.subr.bf16.mxu1 %v2093_v4  ;;  %s1540_s30 = sshll.u32 %s453_s24, 3  ;;  %s1572_s13 = sshll.u32 %s2182_s21, 7 }
  0x79   : > { %s455_s14 = scalar_lea.vmem [#allocation13], %s1540_s30  ;;  %s1392_s21 = scalar_lea.sflag [#allocation4], %s453_s24 }
  0x7a   : > { %v464_v2 = vsel %vm463_vm0, %v462_v1, 0.0  ;;  %s1405_s25 = sshll.u32 %s455_s14, 4  ;;  %p2528_p9 = scmp.ne.s32.totalorder %s2512_s27, 0  ;;  %s2452_s25 = int_to_ptr.vmem [resolvable:$true] %s1405_s25 }
  0x7b   : > { %465 = vadd.xlane.f32.xlu0 %v464_v2  ;;  %s2100_s2 = smov [#allocation13]  }
  0x7c   : > { %s2011_s29 = sshll.u32 %s2100_s2, 4  ;;  %s2012_s29 = int_to_ptr.vmem [resolvable:$false] %s2011_s29 }
  0x7d   : > { %s2013_s15 = scalar_lea.vmem %s2012_s29, 256  ;;  %p2014_p6 = scmp.lt.s32.totalorder %s2452_s25, %s2012_s29 }
 0x104   : > { %v466_v6 = vpop.xlane.xlu0 %465 }
 0x105   : > { %v468_v7 = vmul.f32 0.03125, %v466_v6 }
 0x107   : > { %v469_v8 = vadd.f32 1e-06, %v468_v7 }
 0x109   : > { %1827 = vrsqrt.f32 %v469_v8 }
 0x116   : > { %v1828_v9 = vpop.eup %1827 }
 0x117   : > { %v471_v11 = vmul.f32 %v1828_v9, %v2301_v0 }
 0x119   : > { %v479_v12 = vmul.f32 %v1542_v10, %v471_v11 }
 0x11b   : > { %v480_v13 = vpack.c.bf16 %v479_v12, %v479_v12 }
 0x11d   : > { %1615 = vmatmul.mubr.msk.bf16.vlgmr.msra.gmra.mxu1 %vm463_vm0, %v480_v13 }
 0x11e   : > { %1620 = vmatprep.mubr.msk.bf16.mxu1 %vm2094_vm1, %v2093_v4 }
 0x1dd   : > { %v541_v15 = vpop.f32.mrf.mxu1 }
 0x1de   : > { %v542_v16 = vadd.f32 %v1543_v14, %v541_v15 }
 0x1df   : > { %v1616_v17 = vpop.f32.mrf.mxu1 }
 0x1e0   : > { %551 = vrot.lane.b32.xlu1 %v542_v16, %s2095_s16  ;;  %548 = vrot.lane.b32.xlu0 %v542_v16, %s2096_s12  ;;  %v2324_v20 = vpack.c.bf16 %v542_v16, %v542_v16 }
 0x1e1   : > { %v544_v18 = vpop.f32.mrf.mxu1 }
 0x1e3   : > { %v1617_v19 = vpop.f32.mrf.mxu1 }
 0x1e4   : > { %554 = vrot.lane.b32.xlu1 %v542_v16, %s2097_s19  ;;  %s2450_s19 = scalar_lea.hbm %s2503_s11, %s1572_s13 }
 0x1e8   : > { %562 = vrot.lane.b32.xlu1 %v2324_v20, %s2098_s22 }
 0x252   : > { %v552_v21 = vpop.permute.xlu1 %551  ;;  %v549_v22 = vpop.permute.xlu0 %548 }
 0x253   : > { %v558_v23 = vpack.c.bf16 %v549_v22, %v549_v22  ;;  %v559_v25 = vpack.c.bf16 %v552_v21, %v552_v21 }
 0x255   : > { %612 = vrot.lane.b32.xlu1 %v558_v23, %s2098_s22 }
 0x256   : > { %v555_v24 = vpop.permute.xlu1 %554 }
 0x257   : > { %v2327_v27 = vpack.c.bf16 %v555_v24, %v555_v24 }
 0x259   : > { %661 = vrot.lane.b32.xlu1 %v559_v25, %s2098_s22 }
 0x25a   : > { %v563_v26 = vpop.permute.xlu1 %562 }
 0x25b   : > { %v569_v28 = vsel %vm564_vm2, %v563_v26, 0 }
 0x25c   : > { %1619 = vmatpush3.bf16.xpose.msra.mxu1 %v569_v28 }
 0x25d   : > { %710 = vrot.lane.b32.xlu1 %v2327_v27, %s2098_s22  ;;  %1630 = vmatprep.subr.bf16.mxu1 %v2093_v4  ;;  %s2007_s22 = scalar_lea.vmem %s2452_s25, 128 }
 0x25e   : > { %p2008_p2 = scmp.ne.s32.totalorder %s2452_s25, %s2007_s22  ;;  %p2015_p10 = scmp.lt.s32.totalorder %s2013_s15, %s2007_s22 }
 0x260   : > { %p2009_p3 = pnand %p2008_p2, %p2528_p9  ;;  %p2016_p13 = por %p2015_p10, %p2014_p6 }
 0x262   : > { %p2010_p5 = pneg %p2009_p3 }
 0x263   : > { %1621 = vmatmul.mubr.msk.bf16.vlgmr.msra.gmra.mxu1 %vm564_vm2, %v2324_v20 }
 0x264   : > { %1632 = vmatprep.mubr.msk.bf16.mxu1 %vm2094_vm1, %v2093_v4  ;;  %p2017_p4 = pnand %p2016_p13, %p2010_p5 }
 0x2c7   : > { %v613_v29 = vpop.permute.xlu1 %612 }
 0x2c8   : > { %v618_v30 = vsel %vm564_vm2, %v613_v29, 0  ;;  %v1007_v29 = vld [vmem:[%s2495_s3] sm:$0xf] }
 0x2c9   : > { %1625 = vmatpush3.bf16.xpose.msra.mxu0 %v618_v30  ;;  %v1015_v30 = vsel %vm811_vm3, %v1007_v29, 0 }
 0x2ca   : > { %1636 = vmatprep.subr.bf16.mxu0 %v2093_v4 }
 0x2cb   : > { %v662_v31 = vpop.permute.xlu1 %661 }
 0x2cc   : > { %v667_v32 = vsel %vm564_vm2, %v662_v31, 0  ;;  %v1008_v31 = vld [vmem:[%s2495_s3 + $0x4] sm:$0xf] }
 0x2cd   : > { %1631 = vmatpush3.bf16.xpose.msra.mxu1 %v667_v32  ;;  %v1061_v32 = vsel %vm811_vm3, %v1008_v31, 0 }
 0x2ce   : > { %1642 = vmatprep.subr.bf16.mxu1 %v2093_v4 }
 0x2cf   : > { %v711_v33 = vpop.permute.xlu1 %710 }
 0x2d0   : > { %v716_v34 = vsel %vm564_vm2, %v711_v33, 0  ;;  %1627 = vmatmul.mubr.msk.bf16.vlgmr.msra.gmra.mxu0 %vm564_vm2, %v558_v23 }
 0x2d1   : > { %1637 = vmatpush3.bf16.xpose.msra.mxu0 %v716_v34  ;;  %1638 = vmatprep.mubr.msk.bf16.mxu0 %vm2094_vm1, %v2093_v4 }
 0x2d2   : > { %1648 = vmatprep.subr.bf16.mxu0 %v2093_v4 }
 0x2d4   : > { %1633 = vmatmul.mubr.msk.bf16.vlgmr.msra.gmra.mxu1 %vm564_vm2, %v559_v25 }
 0x2d5   : > { %1644 = vmatprep.mubr.msk.bf16.mxu1 %vm2094_vm1, %v2093_v4 }
 0x2d8   : > { %1639 = vmatmul.mubr.msk.bf16.vlgmr.msra.gmra.mxu0 %vm564_vm2, %v2327_v27 }
 0x2d9   : > { %1650 = vmatprep.mubr.msk.bf16.mxu0 %vm2094_vm1, %v2093_v4 }
 0x323   : > { %v605_v35 = vpop.f32.mrf.mxu1 }
 0x324   : > { %v758_v36 = vmul.f32 0.35355338, %v605_v35 }
 0x325   : > { %v1622_v37 = vpop.f32.mrf.mxu1 }
 0x326   : > { %v762_v38 = vsel %vm564_vm2, %v758_v36, -inf  ;;  %v1009_v37 = vld [vmem:[%s2495_s3 + $0x8] sm:$0xf] }
 0x327   : > { %763 = vmax.xlane.f32.xlu1 %v762_v38  ;;  %v608_v39 = vpop.f32.mrf.mxu1 }
 0x329   : > { %v1623_v40 = vpop.f32.mrf.mxu1 }
 0x338   : > { %855 = vrot.lane.b32.xlu1 %v558_v23, %s2099_s26 }
 0x390   : > { %v654_v41 = vpop.f32.mrf.mxu0 }
 0x391   : > { %v759_v42 = vmul.f32 0.35355338, %v654_v41  ;;  %v1107_v41 = vsel %vm811_vm3, %v1009_v37, 0 }
 0x392   : > { %v1628_v43 = vpop.f32.mrf.mxu0 }
 0x393   : > { %v765_v44 = vsel %vm564_vm2, %v759_v42, -inf }
 0x394   : > { %766 = vmax.xlane.f32.xlu0 %v765_v44  ;;  %v657_v45 = vpop.f32.mrf.mxu0  ;;  %v703_v46 = vpop.f32.mrf.mxu1 }
 0x395   : > { %v760_v62 = vmul.f32 0.35355338, %v703_v46  ;;  %v1010_v46 = vld [vmem:[%s2495_s3 + $0xc] sm:$0xf] }
 0x396   : > { %v1629_v47 = vpop.f32.mrf.mxu0  ;;  %v1634_v48 = vpop.f32.mrf.mxu1 }
 0x397   : > { %v768_v63 = vsel %vm564_vm2, %v760_v62, -inf }
 0x398   : > { %v706_v49 = vpop.f32.mrf.mxu1  ;;  %v752_v50 = vpop.f32.mrf.mxu0 }
 0x399   : > { %v761_v51 = vmul.f32 0.35355338, %v752_v50  ;;  %v1153_v50 = vsel %vm811_vm3, %v1010_v46, 0  ;;  %v1825_v46 = vld [vmem:[%s2501_s9 + $0x8] sm:$0xff]  }
 0x39a   : > { %v1635_v52 = vpop.f32.mrf.mxu1  ;;  %v1640_v53 = vpop.f32.mrf.mxu0 }
 0x39b   : > { %v771_v54 = vsel %vm564_vm2, %v761_v51, -inf }
 0x39c   : > { %v755_v55 = vpop.f32.mrf.mxu0  ;;  %772 = vmax.xlane.f32.xlu1 %v771_v54 }
 0x39e   : > { %v1641_v56 = vpop.f32.mrf.mxu0 }
 0x3aa   : > { %806 = vrot.lane.b32.xlu0 %v2324_v20, %s2099_s26 }
 0x3ad   : > { %903 = vrot.lane.b32.xlu1 %v559_v25, %s2099_s26 }
 0x3b0   : > { %v764_v57 = vpop.xlane.xlu1 %763 }
 0x3b1   : > { %v774_v60 = vsub.f32 %v758_v36, %v764_v57 }
 0x3b3   : > { %v778_v61 = vmul.f32 1.442695, %v774_v60 }
 0x3b4   : > { %v856_v58 = vpop.permute.xlu1 %855 }
 0x3b5   : > { %v861_v59 = vsel %vm811_vm3, %v856_v58, 0  ;;  %1829 = vpow2.f32 %v778_v61 }
 0x3b6   : > { %1649 = vmatpush3.bf16.msra.mxu0 %v861_v59 }
 0x3b7   : > { %1660 = vmatprep.subr.bf16.mxu0 %v2093_v4 }
 0x3c2   : > { %v1830_v1 = vpop.eup %1829 }
 0x3c3   : > { %v786_v2 = vsel %vm564_vm2, %v1830_v1, 0.0  ;;  %v802_v9 = vpack.c.bf16 %v1830_v1, %v1830_v1 }
 0x3c9   : > { %769 = vmax.xlane.f32.xlu0 %v768_v63 }
 0x3d1   : > { %787 = vadd.xlane.f32.xlu1 %v786_v2 }
 0x3df   : > { %951 = vrot.lane.b32.xlu0 %v2327_v27, %s2099_s26 }
 0x41d   : > { %v767_v3 = vpop.xlane.xlu0 %766 }
 0x41e   : > { %v775_v5 = vsub.f32 %v759_v42, %v767_v3 }
 0x420   : > { %v780_v6 = vmul.f32 1.442695, %v775_v5 }
 0x421   : > { %v807_v7 = vpop.permute.xlu0 %806 }
 0x422   : > { %1831 = vpow2.f32 %v780_v6  ;;  %v813_v8 = vsel %vm811_vm3, %v807_v7, 0 }
 0x423   : > { %1643 = vmatpush3.bf16.msra.mxu1 %v813_v8 }
 0x424   : > { %1654 = vmatprep.subr.bf16.mxu1 %v2093_v4 }
 0x425   : > { %v773_v10 = vpop.xlane.xlu1 %772 }
 0x426   : > { %v777_v11 = vsub.f32 %v761_v51, %v773_v10  ;;  %1645 = vmatmul.mubr.msk.bf16.vlgmr.msra.gmra.mxu1 %vm564_vm2, %v802_v9 }
 0x427   : > { %1656 = vmatprep.mubr.msk.bf16.mxu1 %vm2094_vm1, %v2093_v4 }
 0x428   : > { %v784_v12 = vmul.f32 1.442695, %v777_v11 }
 0x429   : > { %v904_v13 = vpop.permute.xlu1 %903 }
 0x42a   : > { %1833 = vpow2.f32 %v784_v12  ;;  %v909_v14 = vsel %vm811_vm3, %v904_v13, 0 }
 0x42b   : > { %1655 = vmatpush3.bf16.msra.mxu1 %v909_v14 }
 0x42c   : > { %1666 = vmatprep.subr.bf16.mxu1 %v2093_v4 }
 0x42f   : > { %v1832_v15 = vpop.eup %1831 }
 0x430   : > { %v789_v16 = vsel %vm564_vm2, %v1832_v15, 0.0  ;;  %v803_v17 = vpack.c.bf16 %v1832_v15, %v1832_v15 }
 0x431   : > { %790 = vadd.xlane.f32.xlu0 %v789_v16 }
 0x432   : > { %1651 = vmatmul.mubr.msk.bf16.vlgmr.msra.gmra.mxu0 %vm564_vm2, %v803_v17 }
 0x433   : > { %1662 = vmatprep.mubr.msk.bf16.mxu0 %vm2094_vm1, %v2093_v4 }
 0x437   : > { %v1834_v18 = vpop.eup %1833 }
 0x438   : > { %v795_v19 = vsel %vm564_vm2, %v1834_v18, 0.0  ;;  %v805_v25 = vpack.c.bf16 %v1834_v18, %v1834_v18 }
 0x439   : > { %796 = vadd.xlane.f32.xlu1 %v795_v19 }
 0x452   : > { %v770_v20 = vpop.xlane.xlu0 %769 }
 0x453   : > { %v776_v21 = vsub.f32 %v760_v62, %v770_v20 }
 0x455   : > { %v782_v22 = vmul.f32 1.442695, %v776_v21 }
 0x456   : > { %v952_v23 = vpop.permute.xlu0 %951 }
 0x457   : > { %1835 = vpow2.f32 %v782_v22  ;;  %v957_v24 = vsel %vm811_vm3, %v952_v23, 0 }
 0x458   : > { %1661 = vmatpush3.bf16.msra.mxu0 %v957_v24 }
 0x459   : > { %1672 = vmatprep.subr.bf16.mxu0 %v2093_v4 }
 0x45a   : > { %v788_v33 = vpop.xlane.xlu1 %787 }
 0x45b   : > { %1663 = vmatmul.mubr.msk.bf16.vlgmr.msra.gmra.mxu0 %vm564_vm2, %v805_v25  ;;  %1837 = vrcp.f32 %v788_v33 }
 0x45c   : > { %1674 = vmatprep.mubr.msk.bf16.mxu0 %vm2094_vm1, %v2093_v4  ;;  %1673 = vmatpush3.bf16.msra.mxu0 %v1061_v32 }
 0x45d   : > { %1684 = vmatprep.subr.bf16.mxu0 %v2093_v4 }
 0x464   : > { %v1836_v26 = vpop.eup %1835 }
 0x465   : > { %v792_v27 = vsel %vm564_vm2, %v1836_v26, 0.0  ;;  %v804_v28 = vpack.c.bf16 %v1836_v26, %v1836_v26 }
 0x466   : > { %793 = vadd.xlane.f32.xlu0 %v792_v27  ;;  %v1559_v27 = vld [vmem:[#allocation5] ss:$0 sm:$0xff] }
 0x467   : > { %1657 = vmatmul.mubr.msk.bf16.vlgmr.msra.gmra.mxu1 %vm564_vm2, %v804_v28 }
 0x468   : > { %1667 = vmatpush3.bf16.msra.mxu1 %v1015_v30  ;;  %1668 = vmatprep.mubr.msk.bf16.mxu1 %vm2094_vm1, %v2093_v4  ;;  %v1838_v35 = vpop.eup %1837 }
 0x469   : > { %1678 = vmatprep.subr.bf16.mxu1 %v2093_v4 }
 0x4ba   : > { %v791_v34 = vpop.xlane.xlu0 %790 }
 0x4bb   : > { %1839 = vrcp.f32 %v791_v34 }
 0x4c2   : > { %v797_v53 = vpop.xlane.xlu1 %796 }
 0x4c3   : > { %1841 = vrcp.f32 %v797_v53 }
 0x4c8   : > { %v1840_v44 = vpop.eup %1839 }
 0x4d0   : > { %v1842_v55 = vpop.eup %1841 }
 0x4e6   : > { %v849_v36 = vpop.f32.mrf.mxu1 }
 0x4e7   : > { %v999_v38 = vmul.f32 %v1838_v35, %v849_v36  ;;  %v1821_v35 = vld [vmem:[#allocation10 + $0x8] sm:$0xff]   ;;  %v1822_v36 = vld [vmem:[#allocation10] sm:$0xff]  }
 0x4e8   : > { %v1646_v39 = vpop.f32.mrf.mxu1 }
 0x4e9   : > { %v1003_v40 = vpack.c.bf16 %v999_v38, %v999_v38 }
 0x4ea   : > { %v852_v42 = vpop.f32.mrf.mxu1 }
 0x4eb   : > { %1669 = vmatmul.mubr.msk.bf16.vlgmr.msra.gmra.mxu1 %vm564_vm2, %v1003_v40 }
 0x4ec   : > { %v1647_v43 = vpop.f32.mrf.mxu1  ;;  %1679 = vmatpush3.bf16.msra.mxu1 %v1107_v41  ;;  %1680 = vmatprep.mubr.msk.bf16.mxu1 %vm2094_vm1, %v2093_v4  ;;  %v1560_v41 = vld [vmem:[#allocation8] ss:$0 sm:$0xff] }
 0x4ed   : > { %1690 = vmatprep.subr.bf16.mxu1 %v2093_v4 }
 0x4ef   : > { %v794_v54 = vpop.xlane.xlu0 %793 }
 0x4f0   : > { %1843 = vrcp.f32 %v794_v54 }
 0x4f2   : > { %v897_v45 = vpop.f32.mrf.mxu0 }
 0x4f3   : > { %v1000_v47 = vmul.f32 %v1840_v44, %v897_v45  ;;  %v1824_v45 = vld [vmem:[%s2501_s9 + $0x10] sm:$0xff]  }
 0x4f4   : > { %v1652_v48 = vpop.f32.mrf.mxu0 }
 0x4f5   : > { %v1004_v49 = vpack.c.bf16 %v1000_v47, %v1000_v47  ;;  %v1826_v47 = vld [vmem:[%s2501_s9] sm:$0xff]   ;;  %v1561_v48 = vld [vmem:[#allocation11] ss:$0 sm:$0xff] }
 0x4f6   : > { %v900_v51 = vpop.f32.mrf.mxu0 }
 0x4f7   : > { %1675 = vmatmul.mubr.msk.bf16.vlgmr.msra.gmra.mxu0 %vm564_vm2, %v1004_v49 }
 0x4f8   : > { %v1653_v52 = vpop.f32.mrf.mxu0  ;;  %1685 = vmatpush3.bf16.msra.mxu0 %v1153_v50  ;;  %1686 = vmatprep.mubr.msk.bf16.mxu0 %vm2094_vm1, %v2093_v4 }
 0x4f9   : > { %1698 = vmatprep.subr.bf16.mxu0 %v2093_v4 }
 0x4fd   : > { %v1844_v62 = vpop.eup %1843 }
 0x51b   : > { %v993_v56 = vpop.f32.mrf.mxu0 }
 0x51c   : > { %v1002_v57 = vmul.f32 %v1842_v55, %v993_v56 }
 0x51d   : > { %v1664_v58 = vpop.f32.mrf.mxu0 }
 0x51e   : > { %v1006_v59 = vpack.c.bf16 %v1002_v57, %v1002_v57 }
 0x51f   : > { %v996_v60 = vpop.f32.mrf.mxu0 }
 0x520   : > { %1687 = vmatmul.mubr.msk.bf16.vlgmr.msra.gmra.mxu0 %vm564_vm2, %v1006_v59 }
 0x521   : > { %v1665_v61 = vpop.f32.mrf.mxu0  ;;  %1706 = vmatprep.mubr.msk.bf16.mxu0 %vm2094_vm1, %v2093_v4 }
 0x527   : > { %v945_v63 = vpop.f32.mrf.mxu1 }
 0x528   : > { %v1001_v1 = vmul.f32 %v1844_v62, %v945_v63  ;;  %v1565_v62 = vld [vmem:[%s2502_s10] ss:$0 sm:$0xff] }
 0x529   : > { %v1658_v2 = vpop.f32.mrf.mxu1 }
 0x52a   : > { %v1005_v3 = vpack.c.bf16 %v1001_v1, %v1001_v1 }
 0x52b   : > { %v948_v5 = vpop.f32.mrf.mxu1 }
 0x52c   : > { %1681 = vmatmul.mubr.msk.bf16.vlgmr.msra.gmra.mxu1 %vm564_vm2, %v1005_v3 }
 0x52d   : > { %v1659_v6 = vpop.f32.mrf.mxu1  ;;  %1694 = vmatprep.mubr.msk.bf16.mxu1 %vm2094_vm1, %v2093_v4  ;;  %1691 = vmatpush3.bf16.msra.mxu1 %v1821_v35 }
 0x52e   : > { %1692 = vmatprep.subr.bf16.mxu1 %v2093_v4 }
 0x531   : > { %1693 = vmatpush3.bf16.msra.mxu1 %v1822_v36 }
 0x5ab   : > { %v1051_v7 = vpop.f32.mrf.mxu1 }
 0x5ac   : > { %v1195_v20 = vsel %vm463_vm0, %v1051_v7, 0.0 }
 0x5ad   : > { %v1670_v8 = vpop.f32.mrf.mxu1 }
 0x5af   : > { %v1054_v9 = vpop.f32.mrf.mxu1 }
 0x5b1   : > { %v1671_v10 = vpop.f32.mrf.mxu1 }
 0x5b7   : > { %v1097_v11 = vpop.f32.mrf.mxu0 }
 0x5b8   : > { %v1196_v19 = vsel %vm463_vm0, %v1097_v11, 0.0 }
 0x5b9   : > { %v1676_v12 = vpop.f32.mrf.mxu0  ;;  %v1197_v21 = vadd.f32 %v1196_v19, %v1195_v20 }
 0x5bb   : > { %v1100_v13 = vpop.f32.mrf.mxu0 }
 0x5bd   : > { %v1677_v14 = vpop.f32.mrf.mxu0 }
 0x5e0   : > { %v1189_v15 = vpop.f32.mrf.mxu0 }
 0x5e1   : > { %v1200_v26 = vsel %vm463_vm0, %v1189_v15, 0.0 }
 0x5e2   : > { %v1688_v16 = vpop.f32.mrf.mxu0 }
 0x5e4   : > { %v1192_v17 = vpop.f32.mrf.mxu0 }
 0x5e6   : > { %v1689_v18 = vpop.f32.mrf.mxu0 }
 0x5ec   : > { %v1143_v22 = vpop.f32.mrf.mxu1 }
 0x5ed   : > { %v1198_v23 = vsel %vm463_vm0, %v1143_v22, 0.0 }
 0x5ee   : > { %v1199_v24 = vadd.f32 %v1198_v23, %v1197_v21  ;;  %v1682_v25 = vpop.f32.mrf.mxu1 }
 0x5f0   : > { %v1201_v28 = vadd.f32 %v1200_v26, %v1199_v24  ;;  %v1146_v29 = vpop.f32.mrf.mxu1 }
 0x5f2   : > { %v1209_v30 = vadd.f32 %v1559_v27, %v1201_v28  ;;  %v1683_v31 = vpop.f32.mrf.mxu1 }
 0x5f4   : > { %v1210_v32 = vadd.f32 %v1209_v30, %v2301_v0  ;;  %v1823_v0 = vld [vmem:[%s2501_s9 + $0x18] sm:$0xff]  }
 0x5f5   : > { %1699 = vmatpush3.bf16.msra.mxu0 %v1823_v0 }
 0x5f6   : > { %v1211_v33 = vmul.f32 %v1210_v32, %v1210_v32  ;;  %1700 = vmatprep.subr.bf16.mxu0 %v2093_v4 }
 0x5f8   : > { %v1212_v34 = vsel %vm463_vm0, %v1211_v33, 0.0 }
 0x5f9   : > { %1213 = vadd.xlane.f32.xlu0 %v1212_v34  ;;  %1701 = vmatpush3.bf16.msra.mxu0 %v1824_v45 }
 0x5fa   : > { %1702 = vmatprep.subr.bf16.mxu0 %v2093_v4 }
 0x5fd   : > { %1703 = vmatpush3.bf16.msra.mxu0 %v1825_v46 }
 0x5fe   : > { %1704 = vmatprep.subr.bf16.mxu0 %v2093_v4 }
 0x601   : > { %1705 = vmatpush3.bf16.msra.mxu0 %v1826_v47 }
 0x682   : > { %v1214_v37 = vpop.xlane.xlu0 %1213 }
 0x683   : > { %v1215_v38 = vmul.f32 0.03125, %v1214_v37 }
 0x685   : > { %v1216_v39 = vadd.f32 1e-06, %v1215_v38 }
 0x687   : > { %1845 = vrsqrt.f32 %v1216_v39 }
 0x694   : > { %v1846_v40 = vpop.eup %1845 }
 0x695   : > { %v1218_v42 = vmul.f32 %v1846_v40, %v1210_v32 }
 0x697   : > { %v1226_v43 = vmul.f32 %v1560_v41, %v1218_v42 }
 0x699   : > { %v1227_v44 = vpack.c.bf16 %v1226_v43, %v1226_v43 }
 0x69b   : > { %1695 = vmatmul.mubr.msk.bf16.vlgmr.msra.gmra.mxu1 %vm463_vm0, %v1227_v44 }
 0x75b   : > { %v1288_v49 = vpop.f32.mrf.mxu1 }
 0x75c   : > { %v1289_v50 = vadd.f32 %v1561_v48, %v1288_v49 }
 0x75d   : > { %v1696_v51 = vpop.f32.mrf.mxu1 }
 0x75e   : > { %1301 = vrot.lane.b32.xlu1 %v1289_v50, %s2099_s26  ;;  %v1294_v54 = vsub.f32 0.0, %v1289_v50 }
 0x75f   : > { %v1291_v52 = vpop.f32.mrf.mxu1 }
 0x760   : > { %v1295_v55 = vmul.f32 1.442695, %v1294_v54 }
 0x761   : > { %v1697_v53 = vpop.f32.mrf.mxu1 }
 0x762   : > { %1847 = vpow2.f32 %v1295_v55 }
 0x76f   : > { %v1848_v56 = vpop.eup %1847 }
 0x770   : > { %v1297_v4 = vadd.f32 1.0, %v1848_v56 }
 0x772   : > { %1849 = vrcp.f32 %v1297_v4 }
 0x77f   : > { %v1850_v57 = vpop.eup %1849 }
 0x780   : > { %v1299_v58 = vmul.f32 %v1850_v57, %v1289_v50 }
 0x7d0   : > { %v1302_v59 = vpop.permute.xlu1 %1301 }
 0x7d1   : > { %v1304_v60 = vmul.f32 %v1302_v59, %v1299_v58 }
 0x7d3   : > { %v1305_v61 = vpack.c.bf16 %v1304_v60, %v1304_v60 }
 0x7d5   : > { %1707 = vmatmul.mubr.msk.bf16.vlgmr.msra.gmra.mxu0 %vm1345_vm4, %v1305_v61 }
 0x895   : > { %v1383_v63 = vpop.f32.mrf.mxu0 }
 0x896   : > { %v1384_v1 = vadd.f32 %v1565_v62, %v1383_v63 }
 0x897   : > { %v1708_v2 = vpop.f32.mrf.mxu0 }
 0x898   : > { %v1389_v3 = vadd.f32 %v1384_v1, %v1210_v32 }
 0x899   : > { %v1386_v5 = vpop.f32.mrf.mxu0 }
 0x89a   : > { %1390 = vst.msk [vmem:[%s455_s14] sm:$0xff] %vm463_vm0, %v1389_v3 }
 0x89b   : > { %v1709_v6 = vpop.f32.mrf.mxu0 }
 0x89c   : > { %2020 = shalt.err (!%p2017_p4)
}
 0x89d   : > { %s2021_s30 = scalar_lea.hbm %s2450_s19, 128  ;;  %s2025_s4 = scalar_lea.hbm %s2503_s11, 256 }
 0x89e   : > { %p2022_p7 = scmp.ne.s32.totalorder %s2450_s19, %s2021_s30  ;;  %p2026_p11 = scmp.lt.s32.totalorder %s2450_s19, %s2503_s11 }
 0x89f   : > { %p2027_p0 = scmp.lt.s32.totalorder %s2025_s4, %s2021_s30 }
 0x8a0   : > { %p2023_p8 = pnand %p2022_p7, %p2528_p9 }
 0x8a1   : > { %p2028_p1 = por %p2027_p0, %p2026_p11 }
 0x8a2   : > { %p2024_p12 = pneg %p2023_p8 }
 0x8a4   : > { %p2029_p2 = pnand %p2028_p1, %p2024_p12 }
 0x8a6   : > { %2032 = shalt.err (!%p2029_p2)
}
 0x8a7   : > { %1734 = dma.vmem_to_hbm [thread:$0]  (%p2528_p9), %s2452_s25, 128, %s2450_s19, %s1392_s21  }
 0x8a8 PF: > { %p1771_p3 = scmp.ge.s32.totalorder %s2083_s20, 2  ;;  %s1417_s16 = sand.u32 1, %s2071_s17  }
 0x8a9   : > { %p2529_p5 = scmp.ne.s32.totalorder %s2513_s28, 0  ;;  %s1418_s12 = scalar_lea.sflag [#allocation4], %s1417_s16 }
 0x8ab   : > { %p1756_p6 = pnand %p1771_p3, %p2529_p5 }
 0x8ad   : > { %p1757_p10 = pneg %p1756_p6 }
 0x8af   : > { %2066 = dma.done.wait (%p1757_p10), %s1418_s12, 128  }
 0x8b0   : > { %2068 = vsyncadd (%p1757_p10), %s1418_s12, 4294967168  ;;  %s2530_s22 = sld [smem:[#allocation19_spill]]  ;;  %p25_p13 = scmp.ge.s32.totalorder %s2186_s23, 4  }
 0x8b1   : > { %s2531_s19 = sld [smem:[#allocation20_spill]]  ;;  %s2532_s17 = smov %s2075_s18 }
 0x8b2   : > { %s2534_s20 = smov %s2186_s23  ;;  %27 = sbr.rel (!%p25_p13) target bundleno = 10 (0xa), region = 124 }
 0x8b6   : > { %s2533_s18 = smov %s2530_s22 }
 0x8b7   :  { %1423 = vsyncpa [#allocation3], 1 }
 0x8b8   :  { %1425 = vsyncpa [#allocation3 + $0x1], 1 }
 0x8b9   :  { %1426 = vsyncpa [#allocation6], 1 }
 0x8ba   :  { %1427 = vsyncpa [#allocation9], 1 }
 0x8bb   :  { %1428 = vsyncpa [#allocation12], 1 }
 0x8bc   :  { %1429 = vsyncpa [#allocation4], 1 }
 0x8bd   :  { %1431 = vsyncpa [#allocation4 + $0x1], 1 }

</bundles_post_ra>
